<compile_context>
chip_gen: v7x
topology: tpu7x:2x2x1
jax: 0.10.0
libtpu: 0.0.40
codegen_flags: <defaults>
</compile_context>

<pallas_src>
import jax
import jax.numpy as jnp
from jax.experimental import pallas as pl
from jax.experimental.pallas import tpu as pltpu


def _mlp_kernel(x_ref, w1_ref, b1_ref, w2_ref, b2_ref, w3_ref, b3_ref, o_ref):
    # Layer 1: (tile_b, in) @ (in, hid) on the MXU -- bf16 inputs, f32 accumulate.
    h1 = jnp.dot(x_ref[...], w1_ref[...], preferred_element_type=jnp.float32)
    h1 = jnp.maximum(h1 + b1_ref[...], 0.0)           # f32 bias + ReLU (VPU)
    # Dropout(0.3): identity in eval mode.

    # Layer 2: (tile_b, hid) @ (hid, half) -- cast activations to bf16 for the MXU.
    h2 = jnp.dot(h1.astype(jnp.bfloat16), w2_ref[...],
                 preferred_element_type=jnp.float32)
    h2 = jnp.maximum(h2 + b2_ref[...], 0.0)
    # Dropout(0.3): identity in eval mode.

    # Layer 3: contract the feature axis with w3 as the (1, half) LHS so the
    # result is produced lane-dense as (1, tile_b) -- the tiny GEMV no longer
    # dictates a (tile_b, 1) masked-store output layout.
    logit = jax.lax.dot_general(
        w3_ref[...], h2,
        dimension_numbers=(((1,), (1,)), ((), ())),
        preferred_element_type=jnp.float32)            # (1, tile_b) f32
    logit = logit + b3_ref[0]                          # scalar bias from SMEM

    # Sigmoid in f32: exp on the EUP, approximate reciprocal on the EUP.
    o_ref[...] = (pl.reciprocal(1.0 + jnp.exp(-logit), approx=True)
                  ).astype(o_ref.dtype)


def _default_tile_b(B):
    # Whole batch in one step when small; otherwise 128/256-row tiles
    # (lane-dense output blocks need tile_b % 128 == 0), preferring >= 2 grid
    # steps so both v7x TensorCores get work.
    if B <= 128:
        return B
    if B % 256 == 0 and B >= 512:
        return 256
    if B % 128 == 0:
        return 128
    return B  # fall back to a single full-batch step


def _build_call(B, in_dim, hid, half, tile_b, flops, bytes_accessed,
                single_buffer_weights):
    # Grid-invariant weights: request a single buffer (they never change across
    # steps) so their VMEM cost is 1x instead of the default 2x (double-buffer).
    w_kwargs = dict(pipeline_mode=pl.Buffered(1)) if single_buffer_weights else {}
    grid = (B // tile_b,)
    return pl.pallas_call(
        _mlp_kernel,
        out_shape=jax.ShapeDtypeStruct((1, B), jnp.float32),
        grid_spec=pl.GridSpec(
            grid=grid,
            in_specs=[
                pl.BlockSpec((tile_b, in_dim), lambda i: (i, 0)),          # x tile (bf16)
                pl.BlockSpec((in_dim, hid), lambda i: (0, 0), **w_kwargs),  # W1 (bf16)
                pl.BlockSpec((1, hid), lambda i: (0, 0)),                   # b1 (f32)
                pl.BlockSpec((hid, half), lambda i: (0, 0), **w_kwargs),    # W2 (bf16)
                pl.BlockSpec((1, half), lambda i: (0, 0)),                  # b2 (f32)
                pl.BlockSpec((1, half), lambda i: (0, 0)),                  # w3 row (f32)
                pl.BlockSpec(memory_space=pltpu.MemorySpace.SMEM),          # b3 scalar
            ],
            out_specs=pl.BlockSpec((1, tile_b), lambda i: (0, i)),          # lane-dense
        ),
        compiler_params=pltpu.CompilerParams(
            dimension_semantics=("parallel",),
        ),
        cost_estimate=pl.CostEstimate(
            flops=flops, transcendentals=2 * B, bytes_accessed=bytes_accessed),
    )


def anomaly_detector_forward(x, params, *, tile_b=None):
    """x: (B, input_dim) float32.  Returns (B, 1) float32 anomaly scores."""
    w1, b1, w2, b2, w3, b3 = params
    B, in_dim = x.shape
    hid = w1.shape[1]
    half = w2.shape[1]

    if tile_b is None:
        tile_b = _default_tile_b(B)
    assert B % tile_b == 0
    assert tile_b == B or (tile_b % 128 == 0), (
        "lane-dense (1, tile_b) output blocks need tile_b % 128 == 0 or tile_b == B")

    # bf16 MXU inputs (halves weight/activation DMA bytes); everything else f32.
    x_bf = x.astype(jnp.bfloat16)
    w1_bf = w1.astype(jnp.bfloat16)
    w2_bf = w2.astype(jnp.bfloat16)
    b1_r = b1.reshape(1, hid).astype(jnp.float32)
    b2_r = b2.reshape(1, half).astype(jnp.float32)
    w3_row = w3.reshape(1, half).astype(jnp.float32)
    b3_s = b3.reshape((1,)).astype(jnp.float32)
    args = (x_bf, w1_bf, b1_r, w2_bf, b2_r, w3_row, b3_s)

    flops = 2 * B * (in_dim * hid + hid * half + half)
    bytes_accessed = sum(int(a.size) * a.dtype.itemsize for a in args) + B * 4

    try:
        call = _build_call(B, in_dim, hid, half, tile_b, flops, bytes_accessed,
                           single_buffer_weights=True)
        out_row = jax.block_until_ready(call(*args))
    except Exception:
        # Fall back to default double-buffered weights if this JAX version
        # rejects pl.Buffered(1) on a top-level BlockSpec.
        call = _build_call(B, in_dim, hid, half, tile_b, flops, bytes_accessed,
                           single_buffer_weights=False)
        out_row = call(*args)

    # (1, B) -> (B, 1): same row-major linear layout, free reshape in XLA.
    return out_row.reshape(B, 1)


def init_params(key, input_dim, hidden_dim):
    """Deterministic init mirroring nn.Linear shapes (stored transposed: (in, out))."""
    half = hidden_dim // 2
    ks = jax.random.split(key, 6)

    def lin(kw, kb, fan_in, fan_out):
        bound = 1.0 / jnp.sqrt(fan_in)
        w = jax.random.uniform(kw, (fan_in, fan_out), jnp.float32, -bound, bound)
        b = jax.random.uniform(kb, (fan_out,), jnp.float32, -bound, bound)
        return w, b

    w1, b1 = lin(ks[0], ks[1], input_dim, hidden_dim)
    w2, b2 = lin(ks[2], ks[3], hidden_dim, half)
    w3, b3 = lin(ks[4], ks[5], half, 1)
    return (w1, b1, w2, b2, w3, b3)


def reference_forward_matched(x, params):
    """Mirrors the kernel's precision (bf16 MXU inputs, f32 accumulate/elementwise)."""
    w1, b1, w2, b2, w3, b3 = params
    h1 = jnp.dot(x.astype(jnp.bfloat16), w1.astype(jnp.bfloat16),
                 preferred_element_type=jnp.float32) + b1.reshape(1, -1)
    h1 = jnp.maximum(h1, 0.0)
    h2 = jnp.dot(h1.astype(jnp.bfloat16), w2.astype(jnp.bfloat16),
                 preferred_element_type=jnp.float32) + b2.reshape(1, -1)
    h2 = jnp.maximum(h2, 0.0)
    logit = h2 @ w3.reshape(-1, 1) + b3.reshape(1, 1)
    return jax.nn.sigmoid(logit)


def reference_forward_f32(x, params):
    """Full-f32 reference (PyTorch module in eval mode)."""
    w1, b1, w2, b2, w3, b3 = params
    h1 = jnp.maximum(x @ w1 + b1.reshape(1, -1), 0.0)   # Dropout(0.3) -> identity
    h2 = jnp.maximum(h1 @ w2 + b2.reshape(1, -1), 0.0)  # Dropout(0.3) -> identity
    return jax.nn.sigmoid(h2 @ w3.reshape(-1, 1) + b3.reshape(1, 1))
    # TODO(synk): training-mode dropout (stochastic masking) not implemented;
    # would use pltpu.prng_seed + pltpu.prng_random_bits inside the kernel.


if __name__ == "__main__":
    INPUT_DIM = 512
    HIDDEN_DIM = 256
    BATCH = 16

    key = jax.random.PRNGKey(0)
    k_x, k_p = jax.random.split(key)

    x = jax.random.normal(k_x, (BATCH, INPUT_DIM), dtype=jnp.float32)
    params = init_params(k_p, INPUT_DIM, HIDDEN_DIM)

    out = anomaly_detector_forward(x, params)
    out = jax.block_until_ready(out)
    assert out.shape == (BATCH, 1)

    ref_matched = reference_forward_matched(x, params)
    ref_f32 = reference_forward_f32(x, params)
    assert jnp.allclose(out, ref_matched, atol=2e-3, rtol=0.0), (
        float(jnp.max(jnp.abs(out - ref_matched))))
    assert jnp.allclose(out, ref_f32, atol=3e-2, rtol=0.0), (
        float(jnp.max(jnp.abs(out - ref_f32))))

    print("KERNEL_OK")
</pallas_src>

<mosaic_0001>
module attributes {stable_mosaic.version = 11 : i64} {
  func.func @_mlp_kernel(%arg0: i32, %arg1: memref<16x512xbf16, #tpu.memory_space<vmem>>, %arg2: memref<512x256xbf16, #tpu.memory_space<vmem>>, %arg3: memref<1x256xf32, #tpu.memory_space<vmem>>, %arg4: memref<256x128xbf16, #tpu.memory_space<vmem>>, %arg5: memref<1x128xf32, #tpu.memory_space<vmem>>, %arg6: memref<1x128xf32, #tpu.memory_space<vmem>>, %arg7: memref<1xf32, #tpu.memory_space<smem>>, %arg8: memref<1x16xf32, #tpu.memory_space<vmem>>) attributes {dimension_semantics = [#tpu.dimension_semantics<parallel>], iteration_bounds = array<i64: 1>, scalar_prefetch = 0 : i64, scratch_operands = 0 : i64, tpu.core_type = #tpu.core_type<tc>, window_params = [{transform_indices = @transform_0, window_bounds = array<i64: 16, 512>}, {pipeline_mode = #tpu.pipeline_mode<synchronous>, transform_indices = @transform_1, window_bounds = array<i64: 512, 256>}, {pipeline_mode = #tpu.pipeline_mode<synchronous>, transform_indices = @transform_2, window_bounds = array<i64: 1, 256>}, {pipeline_mode = #tpu.pipeline_mode<synchronous>, transform_indices = @transform_3, window_bounds = array<i64: 256, 128>}, {pipeline_mode = #tpu.pipeline_mode<synchronous>, transform_indices = @transform_4, window_bounds = array<i64: 1, 128>}, {pipeline_mode = #tpu.pipeline_mode<synchronous>, transform_indices = @transform_5, window_bounds = array<i64: 1, 128>}, {transform_indices = @transform_6, window_bounds = array<i64: 1>}, {transform_indices = @transform_7, window_bounds = array<i64: 1, 16>}]} {
    %c0 = arith.constant 0 : index
    %c0_0 = arith.constant 0 : index
    %0 = vector.load %arg1[%c0, %c0_0] : memref<16x512xbf16, #tpu.memory_space<vmem>>, vector<16x512xbf16>
    %c0_1 = arith.constant 0 : index
    %c0_2 = arith.constant 0 : index
    %1 = vector.load %arg2[%c0_1, %c0_2] : memref<512x256xbf16, #tpu.memory_space<vmem>>, vector<512x256xbf16>
    %cst = arith.constant dense<0.000000e+00> : vector<16x256xf32>
    %2 = tpu.matmul %0, %1, %cst {dimension_numbers = #tpu.dot_dimension_numbers<[1], [0], [0], [1], [0, 0, 1, 1], [], []>} : vector<16x512xbf16>, vector<512x256xbf16>, vector<16x256xf32> -> vector<16x256xf32>
    %c0_3 = arith.constant 0 : index
    %c0_4 = arith.constant 0 : index
    %3 = vector.load %arg3[%c0_3, %c0_4] : memref<1x256xf32, #tpu.memory_space<vmem>>, vector<1x256xf32>
    %4 = vector.broadcast %3 : vector<1x256xf32> to vector<16x256xf32>
    %5 = arith.addf %2, %4 : vector<16x256xf32>
    %cst_5 = arith.constant 0.000000e+00 : f32
    %6 = vector.broadcast %cst_5 : f32 to vector<16x256xf32>
    %7 = arith.maximumf %5, %6 : vector<16x256xf32>
    %8 = arith.truncf %7 : vector<16x256xf32> to vector<16x256xbf16>
    %c0_6 = arith.constant 0 : index
    %c0_7 = arith.constant 0 : index
    %9 = vector.load %arg4[%c0_6, %c0_7] : memref<256x128xbf16, #tpu.memory_space<vmem>>, vector<256x128xbf16>
    %cst_8 = arith.constant dense<0.000000e+00> : vector<16x128xf32>
    %10 = tpu.matmul %8, %9, %cst_8 {dimension_numbers = #tpu.dot_dimension_numbers<[1], [0], [0], [1], [0, 0, 1, 1], [], []>} : vector<16x256xbf16>, vector<256x128xbf16>, vector<16x128xf32> -> vector<16x128xf32>
    %c0_9 = arith.constant 0 : index
    %c0_10 = arith.constant 0 : index
    %11 = vector.load %arg5[%c0_9, %c0_10] : memref<1x128xf32, #tpu.memory_space<vmem>>, vector<1x128xf32>
    %12 = vector.broadcast %11 : vector<1x128xf32> to vector<16x128xf32>
    %13 = arith.addf %10, %12 : vector<16x128xf32>
    %cst_11 = arith.constant 0.000000e+00 : f32
    %14 = vector.broadcast %cst_11 : f32 to vector<16x128xf32>
    %15 = arith.maximumf %13, %14 : vector<16x128xf32>
    %c0_12 = arith.constant 0 : index
    %c0_13 = arith.constant 0 : index
    %16 = vector.load %arg6[%c0_12, %c0_13] : memref<1x128xf32, #tpu.memory_space<vmem>>, vector<1x128xf32>
    %cst_14 = arith.constant dense<0.000000e+00> : vector<1x16xf32>
    %17 = tpu.matmul %16, %15, %cst_14 {dimension_numbers = #tpu.dot_dimension_numbers<[1], [1], [0], [0], [0, 0, 1, 0], [], []>} : vector<1x128xf32>, vector<16x128xf32>, vector<1x16xf32> -> vector<1x16xf32>
    %c0_15 = arith.constant 0 : index
    %18 = memref.load %arg7[%c0_15] : memref<1xf32, #tpu.memory_space<smem>>
    %19 = vector.broadcast %18 : f32 to vector<1x16xf32>
    %20 = arith.addf %17, %19 : vector<1x16xf32>
    %cst_16 = arith.constant 0.000000e+00 : f32
    %21 = vector.broadcast %cst_16 : f32 to vector<1x16xf32>
    %22 = arith.subf %21, %20 : vector<1x16xf32>
    %23 = math.exp %22 : vector<1x16xf32>
    %cst_17 = arith.constant 1.000000e+00 : f32
    %24 = vector.broadcast %cst_17 : f32 to vector<1x16xf32>
    %25 = arith.addf %24, %23 : vector<1x16xf32>
    %26 = tpu.reciprocal %25 {approx = true} : vector<1x16xf32> -> vector<1x16xf32>
    %c0_18 = arith.constant 0 : index
    %c0_19 = arith.constant 0 : index
    %27 = vector.load %arg8[%c0_18, %c0_19] : memref<1x16xf32, #tpu.memory_space<vmem>>, vector<1x16xf32>
    tpu.vector_store %arg8[%c0_18, %c0_19], %26 {strides = array<i32>} : memref<1x16xf32, #tpu.memory_space<vmem>>, vector<1x16xf32>,
    return
  }
  func.func @transform_0(%arg0: i32) -> (i32, i32) {
    %c0_i32 = arith.constant 0 : i32
    %c0_i32_0 = arith.constant 0 : i32
    return %arg0, %c0_i32 : i32, i32
  }
  func.func @transform_1(%arg0: i32) -> (i32, i32) {
    %c0_i32 = arith.constant 0 : i32
    %c0_i32_0 = arith.constant 0 : i32
    %c0_i32_1 = arith.constant 0 : i32
    return %c0_i32, %c0_i32_0 : i32, i32
  }
  func.func @transform_2(%arg0: i32) -> (i32, i32) {
    %c0_i32 = arith.constant 0 : i32
    %c0_i32_0 = arith.constant 0 : i32
    %c0_i32_1 = arith.constant 0 : i32
    return %c0_i32, %c0_i32_0 : i32, i32
  }
  func.func @transform_3(%arg0: i32) -> (i32, i32) {
    %c0_i32 = arith.constant 0 : i32
    %c0_i32_0 = arith.constant 0 : i32
    %c0_i32_1 = arith.constant 0 : i32
    return %c0_i32, %c0_i32_0 : i32, i32
  }
  func.func @transform_4(%arg0: i32) -> (i32, i32) {
    %c0_i32 = arith.constant 0 : i32
    %c0_i32_0 = arith.constant 0 : i32
    %c0_i32_1 = arith.constant 0 : i32
    return %c0_i32, %c0_i32_0 : i32, i32
  }
  func.func @transform_5(%arg0: i32) -> (i32, i32) {
    %c0_i32 = arith.constant 0 : i32
    %c0_i32_0 = arith.constant 0 : i32
    %c0_i32_1 = arith.constant 0 : i32
    return %c0_i32, %c0_i32_0 : i32, i32
  }
  func.func @transform_6(%arg0: i32) -> i32 {
    %c0_i32 = arith.constant 0 : i32
    %c0_i32_0 = arith.constant 0 : i32
    return %c0_i32 : i32
  }
  func.func @transform_7(%arg0: i32) -> (i32, i32) {
    %c0_i32 = arith.constant 0 : i32
    %c0_i32_0 = arith.constant 0 : i32
    return %c0_i32, %arg0 : i32, i32
  }
}

module attributes {stable_mosaic.version = 11 : i64} {
  func.func @_mlp_kernel(%arg0: i32, %arg1: memref<16x512xbf16, #tpu.memory_space<vmem>>, %arg2: memref<512x256xbf16, #tpu.memory_space<vmem>>, %arg3: memref<1x256xf32, #tpu.memory_space<vmem>>, %arg4: memref<256x128xbf16, #tpu.memory_space<vmem>>, %arg5: memref<1x128xf32, #tpu.memory_space<vmem>>, %arg6: memref<1x128xf32, #tpu.memory_space<vmem>>, %arg7: memref<1xf32, #tpu.memory_space<smem>>, %arg8: memref<1x16xf32, #tpu.memory_space<vmem>>) attributes {dimension_semantics = [#tpu.dimension_semantics<parallel>], iteration_bounds = array<i64: 1>, scalar_prefetch = 0 : i64, scratch_operands = 0 : i64, tpu.core_type = #tpu.core_type<tc>, window_params = [{transform_indices = @transform_0, window_bounds = array<i64: 16, 512>}, {pipeline_mode = #tpu.pipeline_mode<synchronous>, transform_indices = @transform_1, window_bounds = array<i64: 512, 256>}, {pipeline_mode = #tpu.pipeline_mode<synchronous>, transform_indices = @transform_2, window_bounds = array<i64: 1, 256>}, {pipeline_mode = #tpu.pipeline_mode<synchronous>, transform_indices = @transform_3, window_bounds = array<i64: 256, 128>}, {pipeline_mode = #tpu.pipeline_mode<synchronous>, transform_indices = @transform_4, window_bounds = array<i64: 1, 128>}, {pipeline_mode = #tpu.pipeline_mode<synchronous>, transform_indices = @transform_5, window_bounds = array<i64: 1, 128>}, {transform_indices = @transform_6, window_bounds = array<i64: 1>}, {transform_indices = @transform_7, window_bounds = array<i64: 1, 16>}]} {
    %c0 = arith.constant 0 : index
    %c0_0 = arith.constant 0 : index
    %0 = vector.load %arg1[%c0, %c0_0] : memref<16x512xbf16, #tpu.memory_space<vmem>>, vector<16x512xbf16>
    %c0_1 = arith.constant 0 : index
    %c0_2 = arith.constant 0 : index
    %1 = vector.load %arg2[%c0_1, %c0_2] : memref<512x256xbf16, #tpu.memory_space<vmem>>, vector<512x256xbf16>
    %cst = arith.constant dense<0.000000e+00> : vector<16x256xf32>
    %2 = tpu.matmul %0, %1, %cst {dimension_numbers = #tpu.dot_dimension_numbers<[1], [0], [0], [1], [0, 0, 1, 1], [], []>} : vector<16x512xbf16>, vector<512x256xbf16>, vector<16x256xf32> -> vector<16x256xf32>
    %c0_3 = arith.constant 0 : index
    %c0_4 = arith.constant 0 : index
    %3 = vector.load %arg3[%c0_3, %c0_4] : memref<1x256xf32, #tpu.memory_space<vmem>>, vector<1x256xf32>
    %4 = vector.broadcast %3 : vector<1x256xf32> to vector<16x256xf32>
    %5 = arith.addf %2, %4 : vector<16x256xf32>
    %cst_5 = arith.constant 0.000000e+00 : f32
    %6 = vector.broadcast %cst_5 : f32 to vector<16x256xf32>
    %7 = arith.maximumf %5, %6 : vector<16x256xf32>
    %8 = arith.truncf %7 : vector<16x256xf32> to vector<16x256xbf16>
    %c0_6 = arith.constant 0 : index
    %c0_7 = arith.constant 0 : index
    %9 = vector.load %arg4[%c0_6, %c0_7] : memref<256x128xbf16, #tpu.memory_space<vmem>>, vector<256x128xbf16>
    %cst_8 = arith.constant dense<0.000000e+00> : vector<16x128xf32>
    %10 = tpu.matmul %8, %9, %cst_8 {dimension_numbers = #tpu.dot_dimension_numbers<[1], [0], [0], [1], [0, 0, 1, 1], [], []>} : vector<16x256xbf16>, vector<256x128xbf16>, vector<16x128xf32> -> vector<16x128xf32>
    %c0_9 = arith.constant 0 : index
    %c0_10 = arith.constant 0 : index
    %11 = vector.load %arg5[%c0_9, %c0_10] : memref<1x128xf32, #tpu.memory_space<vmem>>, vector<1x128xf32>
    %12 = vector.broadcast %11 : vector<1x128xf32> to vector<16x128xf32>
    %13 = arith.addf %10, %12 : vector<16x128xf32>
    %cst_11 = arith.constant 0.000000e+00 : f32
    %14 = vector.broadcast %cst_11 : f32 to vector<16x128xf32>
    %15 = arith.maximumf %13, %14 : vector<16x128xf32>
    %c0_12 = arith.constant 0 : index
    %c0_13 = arith.constant 0 : index
    %16 = vector.load %arg6[%c0_12, %c0_13] : memref<1x128xf32, #tpu.memory_space<vmem>>, vector<1x128xf32>
    %cst_14 = arith.constant dense<0.000000e+00> : vector<1x16xf32>
    %17 = tpu.matmul %16, %15, %cst_14 {dimension_numbers = #tpu.dot_dimension_numbers<[1], [1], [0], [0], [0, 0, 1, 0], [], []>} : vector<1x128xf32>, vector<16x128xf32>, vector<1x16xf32> -> vector<1x16xf32>
    %c0_15 = arith.constant 0 : index
    %18 = memref.load %arg7[%c0_15] : memref<1xf32, #tpu.memory_space<smem>>
    %19 = vector.broadcast %18 : f32 to vector<1x16xf32>
    %20 = arith.addf %17, %19 : vector<1x16xf32>
    %cst_16 = arith.constant 0.000000e+00 : f32
    %21 = vector.broadcast %cst_16 : f32 to vector<1x16xf32>
    %22 = arith.subf %21, %20 : vector<1x16xf32>
    %23 = math.exp %22 : vector<1x16xf32>
    %cst_17 = arith.constant 1.000000e+00 : f32
    %24 = vector.broadcast %cst_17 : f32 to vector<1x16xf32>
    %25 = arith.addf %24, %23 : vector<1x16xf32>
    %26 = tpu.reciprocal %25 {approx = true} : vector<1x16xf32> -> vector<1x16xf32>
    %c0_18 = arith.constant 0 : index
    %c0_19 = arith.constant 0 : index
    %27 = vector.load %arg8[%c0_18, %c0_19] : memref<1x16xf32, #tpu.memory_space<vmem>>, vector<1x16xf32>
    tpu.vector_store %arg8[%c0_18, %c0_19], %26 {strides = array<i32>} : memref<1x16xf32, #tpu.memory_space<vmem>>, vector<1x16xf32>,
    return
  }
  func.func @transform_0(%arg0: i32) -> (i32, i32) {
    %c0_i32 = arith.constant 0 : i32
    %c0_i32_0 = arith.constant 0 : i32
    return %arg0, %c0_i32 : i32, i32
  }
  func.func @transform_1(%arg0: i32) -> (i32, i32) {
    %c0_i32 = arith.constant 0 : i32
    %c0_i32_0 = arith.constant 0 : i32
    %c0_i32_1 = arith.constant 0 : i32
    return %c0_i32, %c0_i32_0 : i32, i32
  }
  func.func @transform_2(%arg0: i32) -> (i32, i32) {
    %c0_i32 = arith.constant 0 : i32
    %c0_i32_0 = arith.constant 0 : i32
    %c0_i32_1 = arith.constant 0 : i32
    return %c0_i32, %c0_i32_0 : i32, i32
  }
  func.func @transform_3(%arg0: i32) -> (i32, i32) {
    %c0_i32 = arith.constant 0 : i32
    %c0_i32_0 = arith.constant 0 : i32
    %c0_i32_1 = arith.constant 0 : i32
    return %c0_i32, %c0_i32_0 : i32, i32
  }
  func.func @transform_4(%arg0: i32) -> (i32, i32) {
    %c0_i32 = arith.constant 0 : i32
    %c0_i32_0 = arith.constant 0 : i32
    %c0_i32_1 = arith.constant 0 : i32
    return %c0_i32, %c0_i32_0 : i32, i32
  }
  func.func @transform_5(%arg0: i32) -> (i32, i32) {
    %c0_i32 = arith.constant 0 : i32
    %c0_i32_0 = arith.constant 0 : i32
    %c0_i32_1 = arith.constant 0 : i32
    return %c0_i32, %c0_i32_0 : i32, i32
  }
  func.func @transform_6(%arg0: i32) -> i32 {
    %c0_i32 = arith.constant 0 : i32
    %c0_i32_0 = arith.constant 0 : i32
    return %c0_i32 : i32
  }
  func.func @transform_7(%arg0: i32) -> (i32, i32) {
    %c0_i32 = arith.constant 0 : i32
    %c0_i32_0 = arith.constant 0 : i32
    return %c0_i32, %arg0 : i32, i32
  }
}

</mosaic_0001>

<bundles_post_ra>
// kernel: tpu_custom_call.1
= control target key start
LH: loop header
LB: loop body
LE: loop exit
PB: predicated region body
PF: predicated region fallthrough
CT: control target
= control target key end

     0   :  { %13 = vsyncpa [#allocation4], 0  ;;  %s1326_s0 = inlined_call_operand.hbm [shape: bf16[16,512], index: 0, kind: input, shape index: {}]   ;;  %s1327_s1 = inlined_call_operand.hbm [shape: bf16[512,256], index: 1, kind: input, shape index: {}]   ;;  %s1328_s2 = inlined_call_operand.vmem [shape: f32[1,256], index: 2, kind: input, shape index: {}]   ;;  %s1329_s3 = inlined_call_operand.hbm [shape: bf16[256,128], index: 3, kind: input, shape index: {}]   ;;  %s1330_s4 = inlined_call_operand.vmem [shape: f32[1,128], index: 4, kind: input, shape index: {}]   ;;  %s1331_s5 = inlined_call_operand.vmem [shape: f32[1,128], index: 5, kind: input, shape index: {}]   ;;  %s1332_s6 = inlined_call_operand.<no memory space> [shape: f32[1], index: 6, kind: input, shape index: {}]   ;;  %s1333_s7 = inlined_call_operand.hbm [shape: f32[1,16], index: 7, kind: output, shape index: {}]  }
   0x1   :  { %14 = vsyncpa [#allocation7], 0 }
   0x2   :  { %15 = vsyncpa [#allocation5], 0  ;;  %s1213_s24 = smov [#allocation6]   ;;  %s1119_s28 = scalar_lea.hbm %s1327_s1, 8192 }
   0x3   :  { %s33_s25 = sshll.u32 %s1213_s24, 4  ;;  %p1120_p0 = scmp.ne.s32.totalorder %s1327_s1, %s1119_s28  ;;  %s34_s25 = int_to_ptr.vmem [resolvable:$true] %s33_s25 }
   0x4   :  { %p1123_p1 = scmp.lt.u32.totalorder %s1119_s28, %s1327_s1 }
   0x6   :  { %p1125_p2 = pnand %p1123_p1, %p1120_p0 }
   0x8   :  { %1128 = shalt.err (!%p1125_p2)
}
   0x9   :  { %s1129_s10 = scalar_lea.vmem %s34_s25, 8192  ;;  %p1134_p4 = scmp.lt.s32.totalorder %s34_s25, %s34_s25 }
   0xa   :  { %p1130_p3 = scmp.ne.s32.totalorder %s34_s25, %s1129_s10  ;;  %p1135_p5 = scmp.lt.s32.totalorder %s1129_s10, %s1129_s10 }
   0xc   :  { %p1136_p6 = por %p1135_p5, %p1134_p4 }
   0xe   :  { %p1137_p7 = pnand %p1136_p6, %p1130_p3 }
  0x10   :  { %1140 = shalt.err (!%p1137_p7)
}
  0x11   :  { %s1214_s11 = smov 128   ;;  %s1215_s12 = smov 8  }
  0x12   :  { %39 = dma.hbm_to_vmem [thread:$0]  %s1327_s1, 8192, %s34_s25, [#allocation7], %s1214_s11, %s1214_s11, %s1215_s12  }
  0x13   :  { %s1216_s15 = smov [#allocation3]   ;;  %s1141_s19 = scalar_lea.hbm %s1326_s0, 512 }
  0x14   :  { %s21_s16 = sshll.u32 %s1216_s15, 4  ;;  %p1142_p8 = scmp.ne.s32.totalorder %s1326_s0, %s1141_s19  ;;  %s22_s16 = int_to_ptr.vmem [resolvable:$true] %s21_s16 }
  0x15   :  { %p1145_p9 = scmp.lt.u32.totalorder %s1141_s19, %s1326_s0 }
  0x17   :  { %p1147_p10 = pnand %p1145_p9, %p1142_p8 }
  0x19   :  { %1150 = shalt.err (!%p1147_p10)
}
  0x1a   :  { %s1151_s24 = scalar_lea.vmem %s22_s16, 512  ;;  %p1156_p12 = scmp.lt.s32.totalorder %s22_s16, %s22_s16 }
  0x1b   :  { %p1152_p11 = scmp.ne.s32.totalorder %s22_s16, %s1151_s24  ;;  %p1157_p13 = scmp.lt.s32.totalorder %s1151_s24, %s1151_s24 }
  0x1d   :  { %p1158_p0 = por %p1157_p13, %p1156_p12 }
  0x1f   :  { %p1159_p1 = pnand %p1158_p0, %p1152_p11 }
  0x21   :  { %1162 = shalt.err (!%p1159_p1)
}
  0x22   :  { %s1217_s1 = smov 256   ;;  %s1218_s25 = smov 16  }
  0x23   :  { %27 = dma.hbm_to_vmem [thread:$0]  %s1326_s0, 512, %s22_s16, [#allocation4], %s1217_s1, %s1217_s1, %s1218_s25  }
  0x24   :  { %s1219_s28 = smov [#allocation8]   ;;  %s1163_s9 = scalar_lea.hbm %s1329_s3, 2048 }
  0x25   :  { %s47_s29 = sshll.u32 %s1219_s28, 4  ;;  %p1164_p2 = scmp.ne.s32.totalorder %s1329_s3, %s1163_s9  ;;  %s48_s29 = int_to_ptr.vmem [resolvable:$true] %s47_s29 }
  0x26   :  { %p1167_p3 = scmp.lt.u32.totalorder %s1163_s9, %s1329_s3 }
  0x28   :  { %p1169_p4 = pnand %p1167_p3, %p1164_p2 }
  0x2a   :  { %1172 = shalt.err (!%p1169_p4)
}
  0x2b   :  { %s1173_s14 = scalar_lea.vmem %s48_s29, 2048  ;;  %p1178_p6 = scmp.lt.s32.totalorder %s48_s29, %s48_s29 }
  0x2c   :  { %p1174_p5 = scmp.ne.s32.totalorder %s48_s29, %s1173_s14  ;;  %p1179_p7 = scmp.lt.s32.totalorder %s1173_s14, %s1173_s14 }
  0x2e   :  { %p1180_p8 = por %p1179_p7, %p1178_p6 }
  0x30   :  { %p1181_p9 = pnand %p1180_p8, %p1174_p5 }
  0x32   :  { %1184 = shalt.err (!%p1181_p9)
}
  0x33   :  { %s1220_s0 = smov 64   ;;  %s1221_s15 = smov 4  }
  0x34   :  { %53 = dma.hbm_to_vmem [thread:$0]  %s1329_s3, 2048, %s48_s29, [#allocation7], %s1220_s0, %s1220_s0, %s1221_s15  }
  0x35   :  { %1207 = dma.done.wait [#allocation4], 512  }
  0x36   :  { %1208 = vsyncadd [#allocation4], 4294966784 }
  0x37   :  { %1209 = dma.done.wait [#allocation7], 10240  }
  0x38   :  { %1210 = vsyncadd [#allocation7], 4294957056  ;;  %v997_v0 = vld [vmem:[#allocation6 + $0x4] ss:$8 sps:$4 sm:$0xff]   ;;  %v1001_v2 = vld [vmem:[#allocation6] ss:$8 sps:$4 sm:$0xff]  }
  0x39   :  { %v999_v1 = vld [vmem:[#allocation6 + $0x104] ss:$8 sps:$4 sm:$0xff]   ;;  %490 = vmatprep.subr.bf16.mxu1 %v997_v0  ;;  %v1002_v3 = vld [vmem:[#allocation6 + $0x100] ss:$8 sps:$4 sm:$0xff]   ;;  %v1003_v4 = vld [vmem:[#allocation6 + $0x14] ss:$8 sps:$4 sm:$0xff]  }
  0x3a   :  { %533 = vmatprep.subr.bf16.mxu0 %v999_v1  ;;  %491 = vmatpush1.bf16.msra.mxu1 %v1001_v2  ;;  %v1005_v5 = vld [vmem:[#allocation6 + $0x114] ss:$8 sps:$4 sm:$0xff]   ;;  %v1007_v6 = vld [vmem:[#allocation6 + $0x10] ss:$8 sps:$4 sm:$0xff]   ;;  %v1009_v8 = vld [vmem:[#allocation6 + $0x24] ss:$8 sps:$4 sm:$0xff]  }
  0x3b   :  { %534 = vmatpush1.bf16.msra.mxu0 %v1002_v3  ;;  %492 = vmatprep.subr.bf16.mxu1 %v1003_v4  ;;  %v1008_v7 = vld [vmem:[#allocation6 + $0x110] ss:$8 sps:$4 sm:$0xff]   ;;  %v1011_v9 = vld [vmem:[#allocation6 + $0x124] ss:$8 sps:$4 sm:$0xff]   ;;  %v1013_v10 = vld [vmem:[#allocation6 + $0x20] ss:$8 sps:$4 sm:$0xff]  }
  0x3c   :  { %535 = vmatprep.subr.bf16.mxu0 %v1005_v5  ;;  %v1014_v11 = vld [vmem:[#allocation6 + $0x120] ss:$8 sps:$4 sm:$0xff]   ;;  %v1015_v12 = vld [vmem:[#allocation6 + $0x34] ss:$8 sps:$4 sm:$0xff]   ;;  %v1019_v14 = vld [vmem:[#allocation6 + $0x30] ss:$8 sps:$4 sm:$0xff]  }
  0x3d   :  { %v1017_v13 = vld [vmem:[#allocation6 + $0x134] ss:$8 sps:$4 sm:$0xff]   ;;  %v1020_v15 = vld [vmem:[#allocation6 + $0x130] ss:$8 sps:$4 sm:$0xff]   ;;  %v1021_v16 = vld [vmem:[#allocation6 + $0x44] ss:$8 sps:$4 sm:$0xff]  }
  0x3e   :  { %493 = vmatpush1.bf16.msra.mxu1 %v1007_v6  ;;  %v1023_v17 = vld [vmem:[#allocation6 + $0x144] ss:$8 sps:$4 sm:$0xff]   ;;  %v1025_v18 = vld [vmem:[#allocation6 + $0x40] ss:$8 sps:$4 sm:$0xff]   ;;  %v1027_v20 = vld [vmem:[#allocation6 + $0x54] ss:$8 sps:$4 sm:$0xff]  }
  0x3f   :  { %536 = vmatpush1.bf16.msra.mxu0 %v1008_v7  ;;  %494 = vmatprep.subr.bf16.mxu1 %v1009_v8  ;;  %v1026_v19 = vld [vmem:[#allocation6 + $0x140] ss:$8 sps:$4 sm:$0xff]   ;;  %v1029_v21 = vld [vmem:[#allocation6 + $0x154] ss:$8 sps:$4 sm:$0xff]   ;;  %v1031_v22 = vld [vmem:[#allocation6 + $0x50] ss:$8 sps:$4 sm:$0xff]  }
  0x40   :  { %537 = vmatprep.subr.bf16.mxu0 %v1011_v9  ;;  %v1032_v23 = vld [vmem:[#allocation6 + $0x150] ss:$8 sps:$4 sm:$0xff]   ;;  %v1033_v24 = vld [vmem:[#allocation6 + $0x64] ss:$8 sps:$4 sm:$0xff]   ;;  %v1037_v26 = vld [vmem:[#allocation6 + $0x60] ss:$8 sps:$4 sm:$0xff]  }
  0x41   :  { %v1035_v25 = vld [vmem:[#allocation6 + $0x164] ss:$8 sps:$4 sm:$0xff]   ;;  %v1038_v27 = vld [vmem:[#allocation6 + $0x160] ss:$8 sps:$4 sm:$0xff]   ;;  %v1039_v28 = vld [vmem:[#allocation6 + $0x74] ss:$8 sps:$4 sm:$0xff]  }
  0x42   :  { %495 = vmatpush1.bf16.msra.mxu1 %v1013_v10  ;;  %v1041_v29 = vld [vmem:[#allocation6 + $0x174] ss:$8 sps:$4 sm:$0xff]   ;;  %v1043_v30 = vld [vmem:[#allocation6 + $0x70] ss:$8 sps:$4 sm:$0xff]   ;;  %v1045_v32 = vld [vmem:[#allocation6 + $0x84] ss:$8 sps:$4 sm:$0xff]  }
  0x43   :  { %538 = vmatpush1.bf16.msra.mxu0 %v1014_v11  ;;  %496 = vmatprep.subr.bf16.mxu1 %v1015_v12  ;;  %v1044_v31 = vld [vmem:[#allocation6 + $0x170] ss:$8 sps:$4 sm:$0xff]   ;;  %v1047_v33 = vld [vmem:[#allocation6 + $0x184] ss:$8 sps:$4 sm:$0xff]   ;;  %v1049_v34 = vld [vmem:[#allocation6 + $0x80] ss:$8 sps:$4 sm:$0xff]  }
  0x44   :  { %539 = vmatprep.subr.bf16.mxu0 %v1017_v13  ;;  %v1050_v35 = vld [vmem:[#allocation6 + $0x180] ss:$8 sps:$4 sm:$0xff]   ;;  %v1051_v36 = vld [vmem:[#allocation6 + $0x94] ss:$8 sps:$4 sm:$0xff]   ;;  %v1055_v38 = vld [vmem:[#allocation6 + $0x90] ss:$8 sps:$4 sm:$0xff]  }
  0x45   :  { %v1053_v37 = vld [vmem:[#allocation6 + $0x194] ss:$8 sps:$4 sm:$0xff]   ;;  %v1056_v39 = vld [vmem:[#allocation6 + $0x190] ss:$8 sps:$4 sm:$0xff]   ;;  %v1057_v40 = vld [vmem:[#allocation6 + $0xa4] ss:$8 sps:$4 sm:$0xff]  }
  0x46   :  { %497 = vmatpush1.bf16.msra.mxu1 %v1019_v14  ;;  %v1059_v41 = vld [vmem:[#allocation6 + $0x1a4] ss:$8 sps:$4 sm:$0xff]   ;;  %v1061_v42 = vld [vmem:[#allocation6 + $0xa0] ss:$8 sps:$4 sm:$0xff]   ;;  %v1063_v44 = vld [vmem:[#allocation6 + $0xb4] ss:$8 sps:$4 sm:$0xff]  }
  0x47   :  { %540 = vmatpush1.bf16.msra.mxu0 %v1020_v15  ;;  %498 = vmatprep.subr.bf16.mxu1 %v1021_v16  ;;  %v1062_v43 = vld [vmem:[#allocation6 + $0x1a0] ss:$8 sps:$4 sm:$0xff]   ;;  %v1065_v45 = vld [vmem:[#allocation6 + $0x1b4] ss:$8 sps:$4 sm:$0xff]   ;;  %v1067_v46 = vld [vmem:[#allocation6 + $0xb0] ss:$8 sps:$4 sm:$0xff]  }
  0x48   :  { %541 = vmatprep.subr.bf16.mxu0 %v1023_v17  ;;  %v1068_v47 = vld [vmem:[#allocation6 + $0x1b0] ss:$8 sps:$4 sm:$0xff]   ;;  %v1069_v48 = vld [vmem:[#allocation6 + $0xc4] ss:$8 sps:$4 sm:$0xff]   ;;  %v1073_v52 = vld [vmem:[#allocation6 + $0xc0] ss:$8 sps:$4 sm:$0xff]  }
  0x49   :  { %v1095_v49 = vld [vmem:[#allocation3 + $0x4] ss:$16 sps:$4 sm:$0xff]   ;;  %v1098_v51 = vld [vmem:[#allocation3 + $0xc] ss:$16 sps:$4 sm:$0xff]   ;;  %v1074_v53 = vld [vmem:[#allocation6 + $0x1c0] ss:$8 sps:$4 sm:$0xff]  }
  0x4a   :  { %499 = vmatpush1.bf16.msra.mxu1 %v1025_v18  ;;  %v1071_v50 = vld [vmem:[#allocation6 + $0x1c4] ss:$8 sps:$4 sm:$0xff]   ;;  %522 = vmatprep.mubr.bf16.mxu1 %v1095_v49  ;;  %v1075_v54 = vld [vmem:[#allocation6 + $0xd4] ss:$8 sps:$4 sm:$0xff]   ;;  %v1079_v56 = vld [vmem:[#allocation6 + $0xd0] ss:$8 sps:$4 sm:$0xff]  }
  0x4b   :  { %542 = vmatpush1.bf16.msra.mxu0 %v1026_v19  ;;  %500 = vmatprep.subr.bf16.mxu1 %v1027_v20  ;;  %v1077_v55 = vld [vmem:[#allocation6 + $0x1d4] ss:$8 sps:$4 sm:$0xff]   ;;  %v1080_v57 = vld [vmem:[#allocation6 + $0x1d0] ss:$8 sps:$4 sm:$0xff]   ;;  %v1081_v58 = vld [vmem:[#allocation6 + $0xe4] ss:$8 sps:$4 sm:$0xff]   ;;  %v140_v20 = vlaneseq }
  0x4c   :  { %543 = vmatprep.subr.bf16.mxu0 %v1029_v21  ;;  %565 = vmatprep.mubr.bf16.mxu0 %v1098_v51  ;;  %v1083_v59 = vld [vmem:[#allocation6 + $0x1e4] ss:$8 sps:$4 sm:$0xff]   ;;  %v1085_v60 = vld [vmem:[#allocation6 + $0xe0] ss:$8 sps:$4 sm:$0xff]   ;;  %v1087_v62 = vld [vmem:[#allocation6 + $0xf4] ss:$8 sps:$4 sm:$0xff]  }
  0x4d   :  { %v1086_v61 = vld [vmem:[#allocation6 + $0x1e0] ss:$8 sps:$4 sm:$0xff]   ;;  %v1089_v63 = vld [vmem:[#allocation6 + $0x1f4] ss:$8 sps:$4 sm:$0xff]   ;;  %v1091_v0 = vld [vmem:[#allocation6 + $0xf0] ss:$8 sps:$4 sm:$0xff]  }
  0x4e   :  { %501 = vmatpush1.bf16.msra.mxu1 %v1031_v22  ;;  %v1092_v1 = vld [vmem:[#allocation6 + $0x1f0] ss:$8 sps:$4 sm:$0xff]   ;;  %v1099_v2 = vld [vmem:[#allocation8 + $0x40] sm:$0xff]   ;;  %v1101_v6 = vld [vmem:[#allocation8 + $0x48] sm:$0xff]   ;;  %v141_v21 = vshrl.u32 %v140_v20, 7  ;;  %v1222_v49 = vmov 0.0|0.0  }
  0x4f   :  { %544 = vmatpush1.bf16.msra.mxu0 %v1032_v23  ;;  %502 = vmatprep.subr.bf16.mxu1 %v1033_v24  ;;  %v1093_v3 = vld [vmem:[#allocation3] ss:$16 sps:$4 sm:$0xff]   ;;  %v1096_v4 = vld [vmem:[#allocation3 + $0x8] ss:$16 sps:$4 sm:$0xff]   ;;  %vm1223_vm0 = vmmov 0   ;;  %vm838_vm1 = vcmask 122880  }
  0x50   :  { %545 = vmatprep.subr.bf16.mxu0 %v1035_v25  ;;  %v1100_v5 = vld [vmem:[#allocation8] sm:$0xff]   ;;  %v1102_v7 = vld [vmem:[#allocation8 + $0x8] sm:$0xff]   ;;  %v1103_v8 = vld [vmem:[#allocation8 + $0x50] sm:$0xff]   ;;  %v142_v22 = vsub.s32 0, %v141_v21  ;;  %v146_v24 = vsub.s32 1, %v141_v21 }
  0x51   :  { %v1104_v9 = vld [vmem:[#allocation8 + $0x10] sm:$0xff]   ;;  %v1105_v10 = vld [vmem:[#allocation8 + $0x58] sm:$0xff]   ;;  %v1107_v12 = vld [vmem:[#allocation8 + $0x60] sm:$0xff]  }
  0x52   :  { %503 = vmatpush1.bf16.msra.mxu1 %v1037_v26  ;;  %v1106_v11 = vld [vmem:[#allocation8 + $0x18] sm:$0xff]   ;;  %v1108_v13 = vld [vmem:[#allocation8 + $0x20] sm:$0xff]   ;;  %v1109_v14 = vld [vmem:[#allocation8 + $0x68] sm:$0xff]  }
  0x53   :  { %546 = vmatpush1.bf16.msra.mxu0 %v1038_v27  ;;  %504 = vmatprep.subr.bf16.mxu1 %v1039_v28  ;;  %v1110_v15 = vld [vmem:[#allocation8 + $0x28] sm:$0xff]   ;;  %v1111_v16 = vld [vmem:[#allocation8 + $0x70] sm:$0xff]   ;;  %v1113_v18 = vld [vmem:[#allocation8 + $0x78] sm:$0xff]  }
  0x54   :  { %547 = vmatprep.subr.bf16.mxu0 %v1041_v29  ;;  %v1112_v17 = vld [vmem:[#allocation8 + $0x30] sm:$0xff]   ;;  %v1114_v19 = vld [vmem:[#allocation8 + $0x38] sm:$0xff]   ;;  %v138_v23 = vld [vmem:[%s1328_s2] sm:$0x3] }
  0x55   :  { %v143_v25 = vrot.slane %v138_v23, %v142_v22  ;;  %v147_v26 = vrot.slane %v138_v23, %v146_v24 }
  0x56   :  { %505 = vmatpush1.bf16.msra.mxu1 %v1043_v30 }
  0x57   :  { %548 = vmatpush1.bf16.msra.mxu0 %v1044_v31  ;;  %506 = vmatprep.subr.bf16.mxu1 %v1045_v32 }
  0x58   :  { %549 = vmatprep.subr.bf16.mxu0 %v1047_v33 }
  0x5a   :  { %507 = vmatpush1.bf16.msra.mxu1 %v1049_v34 }
  0x5b   :  { %550 = vmatpush1.bf16.msra.mxu0 %v1050_v35  ;;  %508 = vmatprep.subr.bf16.mxu1 %v1051_v36 }
  0x5c   :  { %551 = vmatprep.subr.bf16.mxu0 %v1053_v37 }
  0x5e   :  { %509 = vmatpush1.bf16.msra.mxu1 %v1055_v38 }
  0x5f   :  { %552 = vmatpush1.bf16.msra.mxu0 %v1056_v39  ;;  %510 = vmatprep.subr.bf16.mxu1 %v1057_v40 }
  0x60   :  { %553 = vmatprep.subr.bf16.mxu0 %v1059_v41 }
  0x62   :  { %511 = vmatpush1.bf16.msra.mxu1 %v1061_v42 }
  0x63   :  { %554 = vmatpush1.bf16.msra.mxu0 %v1062_v43  ;;  %512 = vmatprep.subr.bf16.mxu1 %v1063_v44 }
  0x64   :  { %555 = vmatprep.subr.bf16.mxu0 %v1065_v45 }
  0x66   :  { %513 = vmatpush1.bf16.msra.mxu1 %v1067_v46 }
  0x67   :  { %556 = vmatpush1.bf16.msra.mxu0 %v1068_v47  ;;  %514 = vmatprep.subr.bf16.mxu1 %v1069_v48 }
  0x68   :  { %557 = vmatprep.subr.bf16.mxu0 %v1071_v50  ;;  %v1224_v50 = vmov 0.0  }
  0x6a   :  { %515 = vmatpush1.bf16.msra.mxu1 %v1073_v52  ;;  %v924_v52 = vld [vmem:[%s1330_s4] ss:$0 sm:$0xff]  ;;  %s1225_s4 = smov [#allocation9]  }
  0x6b   :  { %558 = vmatpush1.bf16.msra.mxu0 %v1074_v53  ;;  %516 = vmatprep.subr.bf16.mxu1 %v1075_v54  ;;  %s846_s24 = sshll.u32 %s1225_s4, 4  ;;  %s847_s24 = int_to_ptr.vmem [resolvable:$true] %s846_s24 }
  0x6c   :  { %559 = vmatprep.subr.bf16.mxu0 %v1077_v55  ;;  %s1189_s1 = scalar_lea.vmem %s847_s24, 32  ;;  %p1190_p11 = scmp.lt.s32.totalorder %s847_s24, %s847_s24 }
  0x6e   :  { %517 = vmatpush1.bf16.msra.mxu1 %v1079_v56 }
  0x6f   :  { %560 = vmatpush1.bf16.msra.mxu0 %v1080_v57  ;;  %518 = vmatprep.subr.bf16.mxu1 %v1081_v58 }
  0x70   :  { %561 = vmatprep.subr.bf16.mxu0 %v1083_v59 }
  0x72   :  { %519 = vmatpush1.bf16.msra.mxu1 %v1085_v60 }
  0x73   :  { %562 = vmatpush1.bf16.msra.mxu0 %v1086_v61  ;;  %520 = vmatprep.subr.bf16.mxu1 %v1087_v62 }
  0x74   :  { %563 = vmatprep.subr.bf16.mxu0 %v1089_v63  ;;  %v760_v63 = vld [vmem:[%s1331_s5] sm:$0x1]  ;;  %s1185_s5 = scalar_lea.vmem %s847_s24, 16 }
  0x75   :  { %p1186_p10 = scmp.ne.s32.totalorder %s847_s24, %s1185_s5  ;;  %p1191_p12 = scmp.lt.s32.totalorder %s1189_s1, %s1185_s5 }
  0x76   :  { %521 = vmatpush1.bf16.msra.mxu1 %v1091_v0  ;;  %v762_v0 = vstv %s1332_s6 }
  0x77   :  { %564 = vmatpush1.bf16.msra.mxu0 %v1092_v1  ;;  %973 = vmatprep.subr.bf16.mxu1 %v1222_v49  ;;  %p1192_p13 = por %p1191_p12, %p1190_p11 }
  0x78   :  { %941 = vmatprep.subr.bf16.mxu0 %v1099_v2 }
  0x79   :  { %523 = vmatmul.mubr.bf16.vlgmr.msra.gmra.mrb[0].mxu1 %v1093_v3  ;;  %p1193_p0 = pnand %p1192_p13, %p1186_p10 }
  0x7a   :  { %566 = vmatmul.mubr.bf16.vlgmr.msra.gmra.mrb[0].mxu0 %v1096_v4  ;;  %970 = vmatprep.mubr.msk.f32.mxu1 %vm1223_vm0, %v1224_v50 }
  0x7b   :  { %942 = vmatpush3.bf16.msra.mxu0 %v1100_v5 }
  0x7c   :  { %943 = vmatprep.subr.bf16.mxu0 %v1101_v6 }
  0x7f   :  { %944 = vmatpush3.bf16.msra.mxu0 %v1102_v7 }
  0x80   :  { %945 = vmatprep.subr.bf16.mxu0 %v1103_v8 }
  0x83   :  { %946 = vmatpush3.bf16.msra.mxu0 %v1104_v9 }
  0x84   :  { %947 = vmatprep.subr.bf16.mxu0 %v1105_v10 }
  0x87   :  { %948 = vmatpush3.bf16.msra.mxu0 %v1106_v11 }
  0x88   :  { %949 = vmatprep.subr.bf16.mxu0 %v1107_v12 }
  0x8b   :  { %950 = vmatpush3.bf16.msra.mxu0 %v1108_v13 }
  0x8c   :  { %951 = vmatprep.subr.bf16.mxu0 %v1109_v14 }
  0x8f   :  { %952 = vmatpush3.bf16.msra.mxu0 %v1110_v15 }
  0x90   :  { %953 = vmatprep.subr.bf16.mxu0 %v1111_v16 }
  0x93   :  { %954 = vmatpush3.bf16.msra.mxu0 %v1112_v17 }
  0x94   :  { %955 = vmatprep.subr.bf16.mxu0 %v1113_v18 }
  0x97   :  { %956 = vmatpush3.bf16.msra.mxu0 %v1114_v19 }
 0x14c   :  { %v524_v27 = vpop.f32.mrb[0].mxu1 }
 0x14d   :  { %v567_v28 = vpop.f32.mrb[0].mxu0  ;;  %v525_v29 = vadd.f32 %v524_v27, %v143_v25  ;;  %v526_v30 = vpop.f32.mrb[1].mxu1 }
 0x14e   :  { %v569_v31 = vpop.f32.mrb[1].mxu0  ;;  %v527_v32 = vadd.f32 %v526_v30, %v147_v26  ;;  %v528_v33 = vpop.f32.mrb[2].mxu1 }
 0x14f   :  { %v571_v34 = vpop.f32.mrb[2].mxu0  ;;  %v568_v35 = vadd.f32 %v567_v28, %v525_v29  ;;  %v529_v36 = vadd.f32 %v528_v33, %v143_v25  ;;  %v530_v37 = vpop.f32.mrb[3].mxu1 }
 0x150   :  { %v573_v38 = vpop.f32.mrb[3].mxu0  ;;  %v570_v39 = vadd.f32 %v569_v31, %v527_v32  ;;  %v531_v40 = vadd.f32 %v530_v37, %v147_v26 }
 0x151   :  { %v572_v41 = vadd.f32 %v571_v34, %v529_v36  ;;  %v576_v43 = vmax.f32 %v568_v35, 0.0 }
 0x152   :  { %v574_v42 = vadd.f32 %v573_v38, %v531_v40  ;;  %v577_v45 = vmax.f32 %v570_v39, 0.0 }
 0x153   :  { %v578_v44 = vmax.f32 %v572_v41, 0.0 }
 0x154   :  { %v579_v46 = vmax.f32 %v574_v42, 0.0 }
 0x155   :  { %v580_v47 = vpack.c.bf16 %v578_v44, %v576_v43 }
 0x156   :  { %v581_v48 = vpack.c.bf16 %v579_v46, %v577_v45 }
 0x158   :  { %749 = vmatprep.mubr.bf16.mxu0 %v581_v48 }
 0x159   :  { %750 = vmatmul.mubr.bf16.vlgmr.msra.gmra.mrb[4].mxu0 %v580_v47 }
 0x22c   :  { %v957_v51 = vpop.f32.mrb[4].mxu0 }
 0x22d   :  { %v958_v53 = vpop.f32.mrb[5].mxu0 }
 0x22e   :  { %v959_v54 = vadd.f32 %v958_v53, %v957_v51  ;;  %v960_v55 = vpop.f32.mrb[6].mxu0 }
 0x22f   :  { %v961_v56 = vpop.f32.mrb[7].mxu0 }
 0x230   :  { %v752_v57 = vadd.f32 %v959_v54, %v924_v52  ;;  %v962_v58 = vadd.f32 %v961_v56, %v960_v55 }
 0x232   :  { %v755_v59 = vadd.f32 %v962_v58, %v924_v52  ;;  %v758_v60 = vmax.f32 %v752_v57, 0.0 }
 0x234   :  { %v759_v61 = vmax.f32 %v755_v59, 0.0 }
 0x236   :  { %v974_v62 = vpack.c.bf16 %v759_v61, %v758_v60 }
 0x238   :  { %975 = vmatpush3.bf16.xpose.msra.mxu1 %v974_v62 }
 0x23f   :  { %971 = vmatmul.mubr.f32.vlgmr.msra.gmra.mrb[4].mxu1 %v760_v63 }
 0x312   :  { %v829_v1 = vpop.f32.mrb[4].mxu1 }
 0x313   :  { %v830_v2 = vadd.f32 %v829_v1, %v762_v0  ;;  %v972_v3 = vpop.f32.mrb[5].mxu1 }
 0x315   :  { %v833_v4 = vsub.f32 0.0, %v830_v2 }
 0x317   :  { %v834_v5 = vmul.f32 1.442695, %v833_v4 }
 0x319   :  { %1115 = vpow2.f32 %v834_v5 }
 0x323   :  { %v1116_v6 = vpop.eup %1115 }
 0x324   :  { %v836_v7 = vadd.f32 1.0, %v1116_v6 }
 0x326   :  { %1117 = vrcp.f32 %v836_v7 }
 0x330   :  { %v1118_v8 = vpop.eup %1117 }
 0x331   :  { %839 = vst.msk [vmem:[#allocation9] sm:$0x1] %vm838_vm1, %v1118_v8 }
 0x332   :  { %1196 = shalt.err (!%p1193_p0)
}
 0x333   :  { %s1197_s26 = scalar_lea.hbm %s1333_s7, 16 }
 0x334   :  { %p1198_p1 = scmp.ne.s32.totalorder %s1333_s7, %s1197_s26  ;;  %p1201_p2 = scmp.lt.u32.totalorder %s1197_s26, %s1333_s7 }
 0x336   :  { %p1203_p3 = pnand %p1201_p2, %p1198_p1 }
 0x338   :  { %1206 = shalt.err (!%p1203_p3)
}
 0x339   :  { %849 = dma.vmem_to_hbm [thread:$0]  %s847_s24, 16, %s1333_s7, [#allocation5]  }
 0x33a   :  { %1211 = dma.done.wait [#allocation5], 16  }
 0x33b   :  { %1212 = vsyncadd [#allocation5], 4294967280 }
 0x33c   :  { %853 = vsyncpa [#allocation4], 1 }
 0x33d   :  { %854 = vsyncpa [#allocation7], 1 }
 0x33e   :  { %855 = vsyncpa [#allocation5], 1 }

// kernel: tpu_custom_call.1
= control target key start
LH: loop header
LB: loop body
LE: loop exit
PB: predicated region body
PF: predicated region fallthrough
CT: control target
= control target key end

     0   :  { %13 = vsyncpa [#allocation4], 0  ;;  %s1326_s0 = inlined_call_operand.hbm [shape: bf16[16,512], index: 0, kind: input, shape index: {}]   ;;  %s1327_s1 = inlined_call_operand.hbm [shape: bf16[512,256], index: 1, kind: input, shape index: {}]   ;;  %s1328_s2 = inlined_call_operand.vmem [shape: f32[1,256], index: 2, kind: input, shape index: {}]   ;;  %s1329_s3 = inlined_call_operand.hbm [shape: bf16[256,128], index: 3, kind: input, shape index: {}]   ;;  %s1330_s4 = inlined_call_operand.vmem [shape: f32[1,128], index: 4, kind: input, shape index: {}]   ;;  %s1331_s5 = inlined_call_operand.vmem [shape: f32[1,128], index: 5, kind: input, shape index: {}]   ;;  %s1332_s6 = inlined_call_operand.<no memory space> [shape: f32[1], index: 6, kind: input, shape index: {}]   ;;  %s1333_s7 = inlined_call_operand.hbm [shape: f32[1,16], index: 7, kind: output, shape index: {}]  }
   0x1   :  { %14 = vsyncpa [#allocation7], 0 }
   0x2   :  { %15 = vsyncpa [#allocation5], 0  ;;  %s1213_s24 = smov [#allocation6]   ;;  %s1119_s28 = scalar_lea.hbm %s1327_s1, 8192 }
   0x3   :  { %s33_s25 = sshll.u32 %s1213_s24, 4  ;;  %p1120_p0 = scmp.ne.s32.totalorder %s1327_s1, %s1119_s28  ;;  %s34_s25 = int_to_ptr.vmem [resolvable:$true] %s33_s25 }
   0x4   :  { %p1123_p1 = scmp.lt.u32.totalorder %s1119_s28, %s1327_s1 }
   0x6   :  { %p1125_p2 = pnand %p1123_p1, %p1120_p0 }
   0x8   :  { %1128 = shalt.err (!%p1125_p2)
}
   0x9   :  { %s1129_s10 = scalar_lea.vmem %s34_s25, 8192  ;;  %p1134_p4 = scmp.lt.s32.totalorder %s34_s25, %s34_s25 }
   0xa   :  { %p1130_p3 = scmp.ne.s32.totalorder %s34_s25, %s1129_s10  ;;  %p1135_p5 = scmp.lt.s32.totalorder %s1129_s10, %s1129_s10 }
   0xc   :  { %p1136_p6 = por %p1135_p5, %p1134_p4 }
   0xe   :  { %p1137_p7 = pnand %p1136_p6, %p1130_p3 }
  0x10   :  { %1140 = shalt.err (!%p1137_p7)
}
  0x11   :  { %s1214_s11 = smov 128   ;;  %s1215_s12 = smov 8  }
  0x12   :  { %39 = dma.hbm_to_vmem [thread:$0]  %s1327_s1, 8192, %s34_s25, [#allocation7], %s1214_s11, %s1214_s11, %s1215_s12  }
  0x13   :  { %s1216_s15 = smov [#allocation3]   ;;  %s1141_s19 = scalar_lea.hbm %s1326_s0, 512 }
  0x14   :  { %s21_s16 = sshll.u32 %s1216_s15, 4  ;;  %p1142_p8 = scmp.ne.s32.totalorder %s1326_s0, %s1141_s19  ;;  %s22_s16 = int_to_ptr.vmem [resolvable:$true] %s21_s16 }
  0x15   :  { %p1145_p9 = scmp.lt.u32.totalorder %s1141_s19, %s1326_s0 }
  0x17   :  { %p1147_p10 = pnand %p1145_p9, %p1142_p8 }
  0x19   :  { %1150 = shalt.err (!%p1147_p10)
}
  0x1a   :  { %s1151_s24 = scalar_lea.vmem %s22_s16, 512  ;;  %p1156_p12 = scmp.lt.s32.totalorder %s22_s16, %s22_s16 }
  0x1b   :  { %p1152_p11 = scmp.ne.s32.totalorder %s22_s16, %s1151_s24  ;;  %p1157_p13 = scmp.lt.s32.totalorder %s1151_s24, %s1151_s24 }
  0x1d   :  { %p1158_p0 = por %p1157_p13, %p1156_p12 }
  0x1f   :  { %p1159_p1 = pnand %p1158_p0, %p1152_p11 }
  0x21   :  { %1162 = shalt.err (!%p1159_p1)
}
  0x22   :  { %s1217_s1 = smov 256   ;;  %s1218_s25 = smov 16  }
  0x23   :  { %27 = dma.hbm_to_vmem [thread:$0]  %s1326_s0, 512, %s22_s16, [#allocation4], %s1217_s1, %s1217_s1, %s1218_s25  }
  0x24   :  { %s1219_s28 = smov [#allocation8]   ;;  %s1163_s9 = scalar_lea.hbm %s1329_s3, 2048 }
  0x25   :  { %s47_s29 = sshll.u32 %s1219_s28, 4  ;;  %p1164_p2 = scmp.ne.s32.totalorder %s1329_s3, %s1163_s9  ;;  %s48_s29 = int_to_ptr.vmem [resolvable:$true] %s47_s29 }
  0x26   :  { %p1167_p3 = scmp.lt.u32.totalorder %s1163_s9, %s1329_s3 }
  0x28   :  { %p1169_p4 = pnand %p1167_p3, %p1164_p2 }
  0x2a   :  { %1172 = shalt.err (!%p1169_p4)
}
  0x2b   :  { %s1173_s14 = scalar_lea.vmem %s48_s29, 2048  ;;  %p1178_p6 = scmp.lt.s32.totalorder %s48_s29, %s48_s29 }
  0x2c   :  { %p1174_p5 = scmp.ne.s32.totalorder %s48_s29, %s1173_s14  ;;  %p1179_p7 = scmp.lt.s32.totalorder %s1173_s14, %s1173_s14 }
  0x2e   :  { %p1180_p8 = por %p1179_p7, %p1178_p6 }
  0x30   :  { %p1181_p9 = pnand %p1180_p8, %p1174_p5 }
  0x32   :  { %1184 = shalt.err (!%p1181_p9)
}
  0x33   :  { %s1220_s0 = smov 64   ;;  %s1221_s15 = smov 4  }
  0x34   :  { %53 = dma.hbm_to_vmem [thread:$0]  %s1329_s3, 2048, %s48_s29, [#allocation7], %s1220_s0, %s1220_s0, %s1221_s15  }
  0x35   :  { %1207 = dma.done.wait [#allocation4], 512  }
  0x36   :  { %1208 = vsyncadd [#allocation4], 4294966784 }
  0x37   :  { %1209 = dma.done.wait [#allocation7], 10240  }
  0x38   :  { %1210 = vsyncadd [#allocation7], 4294957056  ;;  %v997_v0 = vld [vmem:[#allocation6 + $0x4] ss:$8 sps:$4 sm:$0xff]   ;;  %v1001_v2 = vld [vmem:[#allocation6] ss:$8 sps:$4 sm:$0xff]  }
  0x39   :  { %v999_v1 = vld [vmem:[#allocation6 + $0x104] ss:$8 sps:$4 sm:$0xff]   ;;  %490 = vmatprep.subr.bf16.mxu1 %v997_v0  ;;  %v1002_v3 = vld [vmem:[#allocation6 + $0x100] ss:$8 sps:$4 sm:$0xff]   ;;  %v1003_v4 = vld [vmem:[#allocation6 + $0x14] ss:$8 sps:$4 sm:$0xff]  }
  0x3a   :  { %533 = vmatprep.subr.bf16.mxu0 %v999_v1  ;;  %491 = vmatpush1.bf16.msra.mxu1 %v1001_v2  ;;  %v1005_v5 = vld [vmem:[#allocation6 + $0x114] ss:$8 sps:$4 sm:$0xff]   ;;  %v1007_v6 = vld [vmem:[#allocation6 + $0x10] ss:$8 sps:$4 sm:$0xff]   ;;  %v1009_v8 = vld [vmem:[#allocation6 + $0x24] ss:$8 sps:$4 sm:$0xff]  }
  0x3b   :  { %534 = vmatpush1.bf16.msra.mxu0 %v1002_v3  ;;  %492 = vmatprep.subr.bf16.mxu1 %v1003_v4  ;;  %v1008_v7 = vld [vmem:[#allocation6 + $0x110] ss:$8 sps:$4 sm:$0xff]   ;;  %v1011_v9 = vld [vmem:[#allocation6 + $0x124] ss:$8 sps:$4 sm:$0xff]   ;;  %v1013_v10 = vld [vmem:[#allocation6 + $0x20] ss:$8 sps:$4 sm:$0xff]  }
  0x3c   :  { %535 = vmatprep.subr.bf16.mxu0 %v1005_v5  ;;  %v1014_v11 = vld [vmem:[#allocation6 + $0x120] ss:$8 sps:$4 sm:$0xff]   ;;  %v1015_v12 = vld [vmem:[#allocation6 + $0x34] ss:$8 sps:$4 sm:$0xff]   ;;  %v1019_v14 = vld [vmem:[#allocation6 + $0x30] ss:$8 sps:$4 sm:$0xff]  }
  0x3d   :  { %v1017_v13 = vld [vmem:[#allocation6 + $0x134] ss:$8 sps:$4 sm:$0xff]   ;;  %v1020_v15 = vld [vmem:[#allocation6 + $0x130] ss:$8 sps:$4 sm:$0xff]   ;;  %v1021_v16 = vld [vmem:[#allocation6 + $0x44] ss:$8 sps:$4 sm:$0xff]  }
  0x3e   :  { %493 = vmatpush1.bf16.msra.mxu1 %v1007_v6  ;;  %v1023_v17 = vld [vmem:[#allocation6 + $0x144] ss:$8 sps:$4 sm:$0xff]   ;;  %v1025_v18 = vld [vmem:[#allocation6 + $0x40] ss:$8 sps:$4 sm:$0xff]   ;;  %v1027_v20 = vld [vmem:[#allocation6 + $0x54] ss:$8 sps:$4 sm:$0xff]  }
  0x3f   :  { %536 = vmatpush1.bf16.msra.mxu0 %v1008_v7  ;;  %494 = vmatprep.subr.bf16.mxu1 %v1009_v8  ;;  %v1026_v19 = vld [vmem:[#allocation6 + $0x140] ss:$8 sps:$4 sm:$0xff]   ;;  %v1029_v21 = vld [vmem:[#allocation6 + $0x154] ss:$8 sps:$4 sm:$0xff]   ;;  %v1031_v22 = vld [vmem:[#allocation6 + $0x50] ss:$8 sps:$4 sm:$0xff]  }
  0x40   :  { %537 = vmatprep.subr.bf16.mxu0 %v1011_v9  ;;  %v1032_v23 = vld [vmem:[#allocation6 + $0x150] ss:$8 sps:$4 sm:$0xff]   ;;  %v1033_v24 = vld [vmem:[#allocation6 + $0x64] ss:$8 sps:$4 sm:$0xff]   ;;  %v1037_v26 = vld [vmem:[#allocation6 + $0x60] ss:$8 sps:$4 sm:$0xff]  }
  0x41   :  { %v1035_v25 = vld [vmem:[#allocation6 + $0x164] ss:$8 sps:$4 sm:$0xff]   ;;  %v1038_v27 = vld [vmem:[#allocation6 + $0x160] ss:$8 sps:$4 sm:$0xff]   ;;  %v1039_v28 = vld [vmem:[#allocation6 + $0x74] ss:$8 sps:$4 sm:$0xff]  }
  0x42   :  { %495 = vmatpush1.bf16.msra.mxu1 %v1013_v10  ;;  %v1041_v29 = vld [vmem:[#allocation6 + $0x174] ss:$8 sps:$4 sm:$0xff]   ;;  %v1043_v30 = vld [vmem:[#allocation6 + $0x70] ss:$8 sps:$4 sm:$0xff]   ;;  %v1045_v32 = vld [vmem:[#allocation6 + $0x84] ss:$8 sps:$4 sm:$0xff]  }
  0x43   :  { %538 = vmatpush1.bf16.msra.mxu0 %v1014_v11  ;;  %496 = vmatprep.subr.bf16.mxu1 %v1015_v12  ;;  %v1044_v31 = vld [vmem:[#allocation6 + $0x170] ss:$8 sps:$4 sm:$0xff]   ;;  %v1047_v33 = vld [vmem:[#allocation6 + $0x184] ss:$8 sps:$4 sm:$0xff]   ;;  %v1049_v34 = vld [vmem:[#allocation6 + $0x80] ss:$8 sps:$4 sm:$0xff]  }
  0x44   :  { %539 = vmatprep.subr.bf16.mxu0 %v1017_v13  ;;  %v1050_v35 = vld [vmem:[#allocation6 + $0x180] ss:$8 sps:$4 sm:$0xff]   ;;  %v1051_v36 = vld [vmem:[#allocation6 + $0x94] ss:$8 sps:$4 sm:$0xff]   ;;  %v1055_v38 = vld [vmem:[#allocation6 + $0x90] ss:$8 sps:$4 sm:$0xff]  }
  0x45   :  { %v1053_v37 = vld [vmem:[#allocation6 + $0x194] ss:$8 sps:$4 sm:$0xff]   ;;  %v1056_v39 = vld [vmem:[#allocation6 + $0x190] ss:$8 sps:$4 sm:$0xff]   ;;  %v1057_v40 = vld [vmem:[#allocation6 + $0xa4] ss:$8 sps:$4 sm:$0xff]  }
  0x46   :  { %497 = vmatpush1.bf16.msra.mxu1 %v1019_v14  ;;  %v1059_v41 = vld [vmem:[#allocation6 + $0x1a4] ss:$8 sps:$4 sm:$0xff]   ;;  %v1061_v42 = vld [vmem:[#allocation6 + $0xa0] ss:$8 sps:$4 sm:$0xff]   ;;  %v1063_v44 = vld [vmem:[#allocation6 + $0xb4] ss:$8 sps:$4 sm:$0xff]  }
  0x47   :  { %540 = vmatpush1.bf16.msra.mxu0 %v1020_v15  ;;  %498 = vmatprep.subr.bf16.mxu1 %v1021_v16  ;;  %v1062_v43 = vld [vmem:[#allocation6 + $0x1a0] ss:$8 sps:$4 sm:$0xff]   ;;  %v1065_v45 = vld [vmem:[#allocation6 + $0x1b4] ss:$8 sps:$4 sm:$0xff]   ;;  %v1067_v46 = vld [vmem:[#allocation6 + $0xb0] ss:$8 sps:$4 sm:$0xff]  }
  0x48   :  { %541 = vmatprep.subr.bf16.mxu0 %v1023_v17  ;;  %v1068_v47 = vld [vmem:[#allocation6 + $0x1b0] ss:$8 sps:$4 sm:$0xff]   ;;  %v1069_v48 = vld [vmem:[#allocation6 + $0xc4] ss:$8 sps:$4 sm:$0xff]   ;;  %v1073_v52 = vld [vmem:[#allocation6 + $0xc0] ss:$8 sps:$4 sm:$0xff]  }
  0x49   :  { %v1095_v49 = vld [vmem:[#allocation3 + $0x4] ss:$16 sps:$4 sm:$0xff]   ;;  %v1098_v51 = vld [vmem:[#allocation3 + $0xc] ss:$16 sps:$4 sm:$0xff]   ;;  %v1074_v53 = vld [vmem:[#allocation6 + $0x1c0] ss:$8 sps:$4 sm:$0xff]  }
  0x4a   :  { %499 = vmatpush1.bf16.msra.mxu1 %v1025_v18  ;;  %v1071_v50 = vld [vmem:[#allocation6 + $0x1c4] ss:$8 sps:$4 sm:$0xff]   ;;  %522 = vmatprep.mubr.bf16.mxu1 %v1095_v49  ;;  %v1075_v54 = vld [vmem:[#allocation6 + $0xd4] ss:$8 sps:$4 sm:$0xff]   ;;  %v1079_v56 = vld [vmem:[#allocation6 + $0xd0] ss:$8 sps:$4 sm:$0xff]  }
  0x4b   :  { %542 = vmatpush1.bf16.msra.mxu0 %v1026_v19  ;;  %500 = vmatprep.subr.bf16.mxu1 %v1027_v20  ;;  %v1077_v55 = vld [vmem:[#allocation6 + $0x1d4] ss:$8 sps:$4 sm:$0xff]   ;;  %v1080_v57 = vld [vmem:[#allocation6 + $0x1d0] ss:$8 sps:$4 sm:$0xff]   ;;  %v1081_v58 = vld [vmem:[#allocation6 + $0xe4] ss:$8 sps:$4 sm:$0xff]   ;;  %v140_v20 = vlaneseq }
  0x4c   :  { %543 = vmatprep.subr.bf16.mxu0 %v1029_v21  ;;  %565 = vmatprep.mubr.bf16.mxu0 %v1098_v51  ;;  %v1083_v59 = vld [vmem:[#allocation6 + $0x1e4] ss:$8 sps:$4 sm:$0xff]   ;;  %v1085_v60 = vld [vmem:[#allocation6 + $0xe0] ss:$8 sps:$4 sm:$0xff]   ;;  %v1087_v62 = vld [vmem:[#allocation6 + $0xf4] ss:$8 sps:$4 sm:$0xff]  }
  0x4d   :  { %v1086_v61 = vld [vmem:[#allocation6 + $0x1e0] ss:$8 sps:$4 sm:$0xff]   ;;  %v1089_v63 = vld [vmem:[#allocation6 + $0x1f4] ss:$8 sps:$4 sm:$0xff]   ;;  %v1091_v0 = vld [vmem:[#allocation6 + $0xf0] ss:$8 sps:$4 sm:$0xff]  }
  0x4e   :  { %501 = vmatpush1.bf16.msra.mxu1 %v1031_v22  ;;  %v1092_v1 = vld [vmem:[#allocation6 + $0x1f0] ss:$8 sps:$4 sm:$0xff]   ;;  %v1099_v2 = vld [vmem:[#allocation8 + $0x40] sm:$0xff]   ;;  %v1101_v6 = vld [vmem:[#allocation8 + $0x48] sm:$0xff]   ;;  %v141_v21 = vshrl.u32 %v140_v20, 7  ;;  %v1222_v49 = vmov 0.0|0.0  }
  0x4f   :  { %544 = vmatpush1.bf16.msra.mxu0 %v1032_v23  ;;  %502 = vmatprep.subr.bf16.mxu1 %v1033_v24  ;;  %v1093_v3 = vld [vmem:[#allocation3] ss:$16 sps:$4 sm:$0xff]   ;;  %v1096_v4 = vld [vmem:[#allocation3 + $0x8] ss:$16 sps:$4 sm:$0xff]   ;;  %vm1223_vm0 = vmmov 0   ;;  %vm838_vm1 = vcmask 122880  }
  0x50   :  { %545 = vmatprep.subr.bf16.mxu0 %v1035_v25  ;;  %v1100_v5 = vld [vmem:[#allocation8] sm:$0xff]   ;;  %v1102_v7 = vld [vmem:[#allocation8 + $0x8] sm:$0xff]   ;;  %v1103_v8 = vld [vmem:[#allocation8 + $0x50] sm:$0xff]   ;;  %v142_v22 = vsub.s32 0, %v141_v21  ;;  %v146_v24 = vsub.s32 1, %v141_v21 }
  0x51   :  { %v1104_v9 = vld [vmem:[#allocation8 + $0x10] sm:$0xff]   ;;  %v1105_v10 = vld [vmem:[#allocation8 + $0x58] sm:$0xff]   ;;  %v1107_v12 = vld [vmem:[#allocation8 + $0x60] sm:$0xff]  }
  0x52   :  { %503 = vmatpush1.bf16.msra.mxu1 %v1037_v26  ;;  %v1106_v11 = vld [vmem:[#allocation8 + $0x18] sm:$0xff]   ;;  %v1108_v13 = vld [vmem:[#allocation8 + $0x20] sm:$0xff]   ;;  %v1109_v14 = vld [vmem:[#allocation8 + $0x68] sm:$0xff]  }
  0x53   :  { %546 = vmatpush1.bf16.msra.mxu0 %v1038_v27  ;;  %504 = vmatprep.subr.bf16.mxu1 %v1039_v28  ;;  %v1110_v15 = vld [vmem:[#allocation8 + $0x28] sm:$0xff]   ;;  %v1111_v16 = vld [vmem:[#allocation8 + $0x70] sm:$0xff]   ;;  %v1113_v18 = vld [vmem:[#allocation8 + $0x78] sm:$0xff]  }
  0x54   :  { %547 = vmatprep.subr.bf16.mxu0 %v1041_v29  ;;  %v1112_v17 = vld [vmem:[#allocation8 + $0x30] sm:$0xff]   ;;  %v1114_v19 = vld [vmem:[#allocation8 + $0x38] sm:$0xff]   ;;  %v138_v23 = vld [vmem:[%s1328_s2] sm:$0x3] }
  0x55   :  { %v143_v25 = vrot.slane %v138_v23, %v142_v22  ;;  %v147_v26 = vrot.slane %v138_v23, %v146_v24 }
  0x56   :  { %505 = vmatpush1.bf16.msra.mxu1 %v1043_v30 }
  0x57   :  { %548 = vmatpush1.bf16.msra.mxu0 %v1044_v31  ;;  %506 = vmatprep.subr.bf16.mxu1 %v1045_v32 }
  0x58   :  { %549 = vmatprep.subr.bf16.mxu0 %v1047_v33 }
  0x5a   :  { %507 = vmatpush1.bf16.msra.mxu1 %v1049_v34 }
  0x5b   :  { %550 = vmatpush1.bf16.msra.mxu0 %v1050_v35  ;;  %508 = vmatprep.subr.bf16.mxu1 %v1051_v36 }
  0x5c   :  { %551 = vmatprep.subr.bf16.mxu0 %v1053_v37 }
  0x5e   :  { %509 = vmatpush1.bf16.msra.mxu1 %v1055_v38 }
  0x5f   :  { %552 = vmatpush1.bf16.msra.mxu0 %v1056_v39  ;;  %510 = vmatprep.subr.bf16.mxu1 %v1057_v40 }
  0x60   :  { %553 = vmatprep.subr.bf16.mxu0 %v1059_v41 }
  0x62   :  { %511 = vmatpush1.bf16.msra.mxu1 %v1061_v42 }
  0x63   :  { %554 = vmatpush1.bf16.msra.mxu0 %v1062_v43  ;;  %512 = vmatprep.subr.bf16.mxu1 %v1063_v44 }
  0x64   :  { %555 = vmatprep.subr.bf16.mxu0 %v1065_v45 }
  0x66   :  { %513 = vmatpush1.bf16.msra.mxu1 %v1067_v46 }
  0x67   :  { %556 = vmatpush1.bf16.msra.mxu0 %v1068_v47  ;;  %514 = vmatprep.subr.bf16.mxu1 %v1069_v48 }
  0x68   :  { %557 = vmatprep.subr.bf16.mxu0 %v1071_v50  ;;  %v1224_v50 = vmov 0.0  }
  0x6a   :  { %515 = vmatpush1.bf16.msra.mxu1 %v1073_v52  ;;  %v924_v52 = vld [vmem:[%s1330_s4] ss:$0 sm:$0xff]  ;;  %s1225_s4 = smov [#allocation9]  }
  0x6b   :  { %558 = vmatpush1.bf16.msra.mxu0 %v1074_v53  ;;  %516 = vmatprep.subr.bf16.mxu1 %v1075_v54  ;;  %s846_s24 = sshll.u32 %s1225_s4, 4  ;;  %s847_s24 = int_to_ptr.vmem [resolvable:$true] %s846_s24 }
  0x6c   :  { %559 = vmatprep.subr.bf16.mxu0 %v1077_v55  ;;  %s1189_s1 = scalar_lea.vmem %s847_s24, 32  ;;  %p1190_p11 = scmp.lt.s32.totalorder %s847_s24, %s847_s24 }
  0x6e   :  { %517 = vmatpush1.bf16.msra.mxu1 %v1079_v56 }
  0x6f   :  { %560 = vmatpush1.bf16.msra.mxu0 %v1080_v57  ;;  %518 = vmatprep.subr.bf16.mxu1 %v1081_v58 }
  0x70   :  { %561 = vmatprep.subr.bf16.mxu0 %v1083_v59 }
  0x72   :  { %519 = vmatpush1.bf16.msra.mxu1 %v1085_v60 }
  0x73   :  { %562 = vmatpush1.bf16.msra.mxu0 %v1086_v61  ;;  %520 = vmatprep.subr.bf16.mxu1 %v1087_v62 }
  0x74   :  { %563 = vmatprep.subr.bf16.mxu0 %v1089_v63  ;;  %v760_v63 = vld [vmem:[%s1331_s5] sm:$0x1]  ;;  %s1185_s5 = scalar_lea.vmem %s847_s24, 16 }
  0x75   :  { %p1186_p10 = scmp.ne.s32.totalorder %s847_s24, %s1185_s5  ;;  %p1191_p12 = scmp.lt.s32.totalorder %s1189_s1, %s1185_s5 }
  0x76   :  { %521 = vmatpush1.bf16.msra.mxu1 %v1091_v0  ;;  %v762_v0 = vstv %s1332_s6 }
  0x77   :  { %564 = vmatpush1.bf16.msra.mxu0 %v1092_v1  ;;  %973 = vmatprep.subr.bf16.mxu1 %v1222_v49  ;;  %p1192_p13 = por %p1191_p12, %p1190_p11 }
  0x78   :  { %941 = vmatprep.subr.bf16.mxu0 %v1099_v2 }
  0x79   :  { %523 = vmatmul.mubr.bf16.vlgmr.msra.gmra.mrb[0].mxu1 %v1093_v3  ;;  %p1193_p0 = pnand %p1192_p13, %p1186_p10 }
  0x7a   :  { %566 = vmatmul.mubr.bf16.vlgmr.msra.gmra.mrb[0].mxu0 %v1096_v4  ;;  %970 = vmatprep.mubr.msk.f32.mxu1 %vm1223_vm0, %v1224_v50 }
  0x7b   :  { %942 = vmatpush3.bf16.msra.mxu0 %v1100_v5 }
  0x7c   :  { %943 = vmatprep.subr.bf16.mxu0 %v1101_v6 }
  0x7f   :  { %944 = vmatpush3.bf16.msra.mxu0 %v1102_v7 }
  0x80   :  { %945 = vmatprep.subr.bf16.mxu0 %v1103_v8 }
  0x83   :  { %946 = vmatpush3.bf16.msra.mxu0 %v1104_v9 }
  0x84   :  { %947 = vmatprep.subr.bf16.mxu0 %v1105_v10 }
  0x87   :  { %948 = vmatpush3.bf16.msra.mxu0 %v1106_v11 }
  0x88   :  { %949 = vmatprep.subr.bf16.mxu0 %v1107_v12 }
  0x8b   :  { %950 = vmatpush3.bf16.msra.mxu0 %v1108_v13 }
  0x8c   :  { %951 = vmatprep.subr.bf16.mxu0 %v1109_v14 }
  0x8f   :  { %952 = vmatpush3.bf16.msra.mxu0 %v1110_v15 }
  0x90   :  { %953 = vmatprep.subr.bf16.mxu0 %v1111_v16 }
  0x93   :  { %954 = vmatpush3.bf16.msra.mxu0 %v1112_v17 }
  0x94   :  { %955 = vmatprep.subr.bf16.mxu0 %v1113_v18 }
  0x97   :  { %956 = vmatpush3.bf16.msra.mxu0 %v1114_v19 }
 0x14c   :  { %v524_v27 = vpop.f32.mrb[0].mxu1 }
 0x14d   :  { %v567_v28 = vpop.f32.mrb[0].mxu0  ;;  %v525_v29 = vadd.f32 %v524_v27, %v143_v25  ;;  %v526_v30 = vpop.f32.mrb[1].mxu1 }
 0x14e   :  { %v569_v31 = vpop.f32.mrb[1].mxu0  ;;  %v527_v32 = vadd.f32 %v526_v30, %v147_v26  ;;  %v528_v33 = vpop.f32.mrb[2].mxu1 }
 0x14f   :  { %v571_v34 = vpop.f32.mrb[2].mxu0  ;;  %v568_v35 = vadd.f32 %v567_v28, %v525_v29  ;;  %v529_v36 = vadd.f32 %v528_v33, %v143_v25  ;;  %v530_v37 = vpop.f32.mrb[3].mxu1 }
 0x150   :  { %v573_v38 = vpop.f32.mrb[3].mxu0  ;;  %v570_v39 = vadd.f32 %v569_v31, %v527_v32  ;;  %v531_v40 = vadd.f32 %v530_v37, %v147_v26 }
 0x151   :  { %v572_v41 = vadd.f32 %v571_v34, %v529_v36  ;;  %v576_v43 = vmax.f32 %v568_v35, 0.0 }
 0x152   :  { %v574_v42 = vadd.f32 %v573_v38, %v531_v40  ;;  %v577_v45 = vmax.f32 %v570_v39, 0.0 }
 0x153   :  { %v578_v44 = vmax.f32 %v572_v41, 0.0 }
 0x154   :  { %v579_v46 = vmax.f32 %v574_v42, 0.0 }
 0x155   :  { %v580_v47 = vpack.c.bf16 %v578_v44, %v576_v43 }
 0x156   :  { %v581_v48 = vpack.c.bf16 %v579_v46, %v577_v45 }
 0x158   :  { %749 = vmatprep.mubr.bf16.mxu0 %v581_v48 }
 0x159   :  { %750 = vmatmul.mubr.bf16.vlgmr.msra.gmra.mrb[4].mxu0 %v580_v47 }
 0x22c   :  { %v957_v51 = vpop.f32.mrb[4].mxu0 }
 0x22d   :  { %v958_v53 = vpop.f32.mrb[5].mxu0 }
 0x22e   :  { %v959_v54 = vadd.f32 %v958_v53, %v957_v51  ;;  %v960_v55 = vpop.f32.mrb[6].mxu0 }
 0x22f   :  { %v961_v56 = vpop.f32.mrb[7].mxu0 }
 0x230   :  { %v752_v57 = vadd.f32 %v959_v54, %v924_v52  ;;  %v962_v58 = vadd.f32 %v961_v56, %v960_v55 }
 0x232   :  { %v755_v59 = vadd.f32 %v962_v58, %v924_v52  ;;  %v758_v60 = vmax.f32 %v752_v57, 0.0 }
 0x234   :  { %v759_v61 = vmax.f32 %v755_v59, 0.0 }
 0x236   :  { %v974_v62 = vpack.c.bf16 %v759_v61, %v758_v60 }
 0x238   :  { %975 = vmatpush3.bf16.xpose.msra.mxu1 %v974_v62 }
 0x23f   :  { %971 = vmatmul.mubr.f32.vlgmr.msra.gmra.mrb[4].mxu1 %v760_v63 }
 0x312   :  { %v829_v1 = vpop.f32.mrb[4].mxu1 }
 0x313   :  { %v830_v2 = vadd.f32 %v829_v1, %v762_v0  ;;  %v972_v3 = vpop.f32.mrb[5].mxu1 }
 0x315   :  { %v833_v4 = vsub.f32 0.0, %v830_v2 }
 0x317   :  { %v834_v5 = vmul.f32 1.442695, %v833_v4 }
 0x319   :  { %1115 = vpow2.f32 %v834_v5 }
 0x323   :  { %v1116_v6 = vpop.eup %1115 }
 0x324   :  { %v836_v7 = vadd.f32 1.0, %v1116_v6 }
 0x326   :  { %1117 = vrcp.f32 %v836_v7 }
 0x330   :  { %v1118_v8 = vpop.eup %1117 }
 0x331   :  { %839 = vst.msk [vmem:[#allocation9] sm:$0x1] %vm838_vm1, %v1118_v8 }
 0x332   :  { %1196 = shalt.err (!%p1193_p0)
}
 0x333   :  { %s1197_s26 = scalar_lea.hbm %s1333_s7, 16 }
 0x334   :  { %p1198_p1 = scmp.ne.s32.totalorder %s1333_s7, %s1197_s26  ;;  %p1201_p2 = scmp.lt.u32.totalorder %s1197_s26, %s1333_s7 }
 0x336   :  { %p1203_p3 = pnand %p1201_p2, %p1198_p1 }
 0x338   :  { %1206 = shalt.err (!%p1203_p3)
}
 0x339   :  { %849 = dma.vmem_to_hbm [thread:$0]  %s847_s24, 16, %s1333_s7, [#allocation5]  }
 0x33a   :  { %1211 = dma.done.wait [#allocation5], 16  }
 0x33b   :  { %1212 = vsyncadd [#allocation5], 4294967280 }
 0x33c   :  { %853 = vsyncpa [#allocation4], 1 }
 0x33d   :  { %854 = vsyncpa [#allocation7], 1 }
 0x33e   :  { %855 = vsyncpa [#allocation5], 1 }

</bundles_post_ra>
